<compile_context>
chip_gen: v7x
topology: tpu7x:2x2x1
jax: 0.10.0
libtpu: 0.0.40
codegen_flags: <defaults>
</compile_context>

<pallas_src>
import functools

import jax
import jax.numpy as jnp
from jax.experimental import pallas as pl
from jax.experimental.pallas import tpu as pltpu


def _round_up(n, m):
    return ((n + m - 1) // m) * m


def _net_kernel(x_ref, bits_ref, w_ref, b_ref, o_ref, *, threshold):
    """Fused dropout-mask + linear + sigmoid for one batch tile.

    x_ref    : VMEM (TB, F)      input tile
    bits_ref : VMEM (TB, F) u32  random bits for the dropout mask
    w_ref    : VMEM (F, O_pad)   weight (transposed torch W; dropout scale folded in)
    b_ref    : VMEM (1, O_pad)   bias
    o_ref    : VMEM (TB, O_pad)  output tile
    """
    x = x_ref[...]
    if threshold > 0:
        # Keep with probability 1-p: integer-domain compare, no float convert.
        keep = bits_ref[...] >= jnp.uint32(threshold)
        x = jnp.where(keep, x, jnp.zeros((), x.dtype))
    y = jnp.dot(x, w_ref[...], preferred_element_type=jnp.float32)
    y = y + b_ref[...].astype(jnp.float32)
    o_ref[...] = jax.nn.sigmoid(y).astype(o_ref.dtype)


def net_forward(x, w_t, b, *, rng_key=None, p=0.1, training=True):
    """x: (B, F); w_t: (F, O) = torch Linear weight transposed; b: (O,)."""
    B, F = x.shape
    Fw, O = w_t.shape
    assert Fw == F
    assert 0.0 <= p < 1.0, "dropout p must be in [0, 1)"

    use_dropout = bool(training) and p > 0.0
    threshold = (
        min(int(round(p * float(1 << 32))), (1 << 32) - 1) if use_dropout else 0
    )

    # Lane-dense output: pad out_features up to a multiple of 128.
    O_pad = _round_up(O, 128)
    # Batch tiling: TB rows per grid step (multiple of 8 sublanes).
    TB = min(256, _round_up(B, 8))
    B_pad = _round_up(B, TB)

    x_p = x if B_pad == B else jnp.pad(x, ((0, B_pad - B), (0, 0)))

    # Fold the inverted-dropout scale 1/(1-p) into the weight (x-scaling and
    # w-scaling are equivalent for x @ W), removing a per-element multiply.
    w_eff = w_t * jnp.asarray(1.0 / (1.0 - p), w_t.dtype) if use_dropout else w_t
    w_p = jnp.pad(w_eff, ((0, 0), (0, O_pad - O))) if O_pad != O else w_eff
    w_p = w_p.astype(x.dtype)
    b_p = (jnp.pad(b, (0, O_pad - O)) if O_pad != O else b)
    b_p = b_p.reshape(1, O_pad).astype(jnp.float32)

    if use_dropout:
        assert rng_key is not None, "training dropout requires rng_key"
        bits = jax.random.bits(rng_key, (B_pad, F), dtype=jnp.uint32)
    else:
        bits = jnp.zeros((B_pad, F), dtype=jnp.uint32)

    kernel = functools.partial(_net_kernel, threshold=threshold)

    out = pl.pallas_call(
        kernel,
        out_shape=jax.ShapeDtypeStruct((B_pad, O_pad), x.dtype),
        grid=(B_pad // TB,),
        in_specs=[
            pl.BlockSpec((TB, F), lambda i: (i, 0)),       # x tile
            pl.BlockSpec((TB, F), lambda i: (i, 0)),       # dropout bits tile
            pl.BlockSpec((F, O_pad), lambda i: (0, 0)),    # weight: VMEM-resident
            pl.BlockSpec((1, O_pad), lambda i: (0, 0)),    # bias: VMEM-resident
        ],
        out_specs=pl.BlockSpec((TB, O_pad), lambda i: (i, 0)),
        compiler_params=pltpu.CompilerParams(
            dimension_semantics=("parallel",),
            vmem_limit_bytes=64 * 1024 * 1024,
        ),
    )(x_p, bits, w_p, b_p)

    return out[:B, :O]


if __name__ == "__main__":
    # Small shapes implied by the module: a plain MLP layer.
    batch, in_features, out_features = 8, 32, 32
    dropout_p = 0.1

    key = jax.random.PRNGKey(0)
    kx, kw, kb, kd = jax.random.split(key, 4)

    x = jax.random.normal(kx, (batch, in_features), dtype=jnp.float32)

    # Deterministic init mirroring torch.nn.Linear: U(-1/sqrt(fan_in), +1/sqrt(fan_in))
    bound = 1.0 / (in_features ** 0.5)
    w = jax.random.uniform(kw, (out_features, in_features),
                           minval=-bound, maxval=bound, dtype=jnp.float32)
    b = jax.random.uniform(kb, (out_features,),
                           minval=-bound, maxval=bound, dtype=jnp.float32)
    w_t = w.T  # (in_features, out_features)

    # Eval-mode forward (dropout = identity) -- check against pure-JAX reference.
    out_eval = net_forward(x, w_t, b, p=dropout_p, training=False)
    jax.block_until_ready(out_eval)
    ref_eval = jax.nn.sigmoid(x @ w_t + b)
    assert out_eval.shape == (batch, out_features)
    assert jnp.allclose(out_eval, ref_eval, atol=1e-5, rtol=1e-5), "eval mismatch"

    # Training-mode forward (dropout active). The mask is deterministic given
    # the rng key, so reproduce it exactly for a full correctness check.
    out_train = net_forward(x, w_t, b, rng_key=kd, p=dropout_p, training=True)
    jax.block_until_ready(out_train)
    bits_ref = jax.random.bits(kd, (batch, in_features), dtype=jnp.uint32)
    thr = min(int(round(dropout_p * float(1 << 32))), (1 << 32) - 1)
    x_drop = jnp.where(bits_ref >= jnp.uint32(thr), x, 0.0) / (1.0 - dropout_p)
    ref_train = jax.nn.sigmoid(x_drop @ w_t + b)
    assert out_train.shape == (batch, out_features)
    assert jnp.allclose(out_train, ref_train, atol=1e-5, rtol=1e-5), "train mismatch"

    print("KERNEL_OK")
</pallas_src>

<mosaic_0001>
module attributes {stable_mosaic.version = 11 : i64} {
  func.func @_net_kernel(%arg0: i32, %arg1: memref<8x32xf32, #tpu.memory_space<vmem>>, %arg2: memref<8x32xi32, #tpu.memory_space<vmem>>, %arg3: memref<32x128xf32, #tpu.memory_space<vmem>>, %arg4: memref<1x128xf32, #tpu.memory_space<vmem>>, %arg5: memref<8x128xf32, #tpu.memory_space<vmem>>) attributes {dimension_semantics = [#tpu.dimension_semantics<parallel>], iteration_bounds = array<i64: 1>, scalar_prefetch = 0 : i64, scratch_operands = 0 : i64, tpu.core_type = #tpu.core_type<tc>, window_params = [{transform_indices = @transform_0, window_bounds = array<i64: 8, 32>}, {transform_indices = @transform_1, window_bounds = array<i64: 8, 32>}, {pipeline_mode = #tpu.pipeline_mode<synchronous>, transform_indices = @transform_2, window_bounds = array<i64: 32, 128>}, {pipeline_mode = #tpu.pipeline_mode<synchronous>, transform_indices = @transform_3, window_bounds = array<i64: 1, 128>}, {transform_indices = @transform_4, window_bounds = array<i64: 8, 128>}]} {
    %c0 = arith.constant 0 : index
    %c0_0 = arith.constant 0 : index
    %0 = vector.load %arg1[%c0, %c0_0] : memref<8x32xf32, #tpu.memory_space<vmem>>, vector<8x32xf32>
    %c0_1 = arith.constant 0 : index
    %c0_2 = arith.constant 0 : index
    %1 = vector.load %arg3[%c0_1, %c0_2] : memref<32x128xf32, #tpu.memory_space<vmem>>, vector<32x128xf32>
    %cst = arith.constant dense<0.000000e+00> : vector<8x128xf32>
    %2 = tpu.matmul %0, %1, %cst {dimension_numbers = #tpu.dot_dimension_numbers<[1], [0], [0], [1], [0, 0, 1, 1], [], []>} : vector<8x32xf32>, vector<32x128xf32>, vector<8x128xf32> -> vector<8x128xf32>
    %c0_3 = arith.constant 0 : index
    %c0_4 = arith.constant 0 : index
    %3 = vector.load %arg4[%c0_3, %c0_4] : memref<1x128xf32, #tpu.memory_space<vmem>>, vector<1x128xf32>
    %4 = vector.broadcast %3 : vector<1x128xf32> to vector<8x128xf32>
    %5 = arith.addf %2, %4 : vector<8x128xf32>
    %6 = arith.negf %5 : vector<8x128xf32>
    %7 = math.exp %6 : vector<8x128xf32>
    %cst_5 = arith.constant 1.000000e+00 : f32
    %8 = vector.broadcast %cst_5 : f32 to vector<8x128xf32>
    %9 = arith.addf %8, %7 : vector<8x128xf32>
    %10 = arith.divf %8, %9 : vector<8x128xf32>
    %c0_6 = arith.constant 0 : index
    %c0_7 = arith.constant 0 : index
    %11 = vector.load %arg5[%c0_6, %c0_7] : memref<8x128xf32, #tpu.memory_space<vmem>>, vector<8x128xf32>
    tpu.vector_store %arg5[%c0_6, %c0_7], %10 {strides = array<i32>} : memref<8x128xf32, #tpu.memory_space<vmem>>, vector<8x128xf32>,
    return
  }
  func.func @transform_0(%arg0: i32) -> (i32, i32) {
    %c0_i32 = arith.constant 0 : i32
    %c0_i32_0 = arith.constant 0 : i32
    return %arg0, %c0_i32 : i32, i32
  }
  func.func @transform_1(%arg0: i32) -> (i32, i32) {
    %c0_i32 = arith.constant 0 : i32
    %c0_i32_0 = arith.constant 0 : i32
    return %arg0, %c0_i32 : i32, i32
  }
  func.func @transform_2(%arg0: i32) -> (i32, i32) {
    %c0_i32 = arith.constant 0 : i32
    %c0_i32_0 = arith.constant 0 : i32
    %c0_i32_1 = arith.constant 0 : i32
    return %c0_i32, %c0_i32_0 : i32, i32
  }
  func.func @transform_3(%arg0: i32) -> (i32, i32) {
    %c0_i32 = arith.constant 0 : i32
    %c0_i32_0 = arith.constant 0 : i32
    %c0_i32_1 = arith.constant 0 : i32
    return %c0_i32, %c0_i32_0 : i32, i32
  }
  func.func @transform_4(%arg0: i32) -> (i32, i32) {
    %c0_i32 = arith.constant 0 : i32
    %c0_i32_0 = arith.constant 0 : i32
    return %arg0, %c0_i32 : i32, i32
  }
}

</mosaic_0001>

<bundles_post_ra>
// kernel: tpu_custom_call.1
= control target key start
LH: loop header
LB: loop body
LE: loop exit
PB: predicated region body
PF: predicated region fallthrough
CT: control target
= control target key end

     0   :  { %9 = vsyncpa [#allocation3], 0  ;;  %s429_s0 = inlined_call_operand.hbm [shape: f32[8,32], index: 0, kind: input, shape index: {}]   ;;  %s430_s1 = inlined_call_operand.hbm [shape: u32[8,32], index: 1, kind: input, shape index: {}]   ;;  %s431_s2 = inlined_call_operand.hbm [shape: f32[32,128], index: 2, kind: input, shape index: {}]   ;;  %s432_s3 = inlined_call_operand.hbm [shape: f32[1,128], index: 3, kind: input, shape index: {}]   ;;  %s433_s4 = inlined_call_operand.hbm [shape: f32[8,128], index: 4, kind: output, shape index: {}]  }
   0x1   :  { %10 = vsyncpa [#allocation6], 0 }
   0x2   :  { %11 = vsyncpa [#allocation9], 0 }
   0x3   :  { %12 = vsyncpa [#allocation4], 0  ;;  %s334_s15 = smov [#allocation5]   ;;  %s335_s17 = smov [#allocation2]  }
   0x4   :  { %s29_s16 = sshll.u32 %s334_s15, 4  ;;  %s19_s18 = sshll.u32 %s335_s17, 4  ;;  %s30_s16 = int_to_ptr.vmem [resolvable:$true] %s29_s16  ;;  %s20_s18 = int_to_ptr.vmem [resolvable:$true] %s19_s18 }
   0x5   :  { %s216_s21 = scalar_lea.hbm %s430_s1, 128 }
   0x6   :  { %p217_p0 = scmp.ne.s32.totalorder %s430_s1, %s216_s21  ;;  %p220_p1 = scmp.lt.u32.totalorder %s216_s21, %s430_s1 }
   0x8   :  { %p222_p2 = pnand %p220_p1, %p217_p0 }
   0xa   :  { %225 = shalt.err (!%p222_p2)
}
   0xb   :  { %s226_s26 = scalar_lea.vmem %s30_s16, 128  ;;  %p231_p4 = scmp.lt.s32.totalorder %s30_s16, %s30_s16 }
   0xc   :  { %p227_p3 = scmp.ne.s32.totalorder %s30_s16, %s226_s26  ;;  %p232_p5 = scmp.lt.s32.totalorder %s226_s26, %s226_s26 }
   0xe   :  { %p233_p6 = por %p232_p5, %p231_p4 }
  0x10   :  { %p234_p7 = pnand %p233_p6, %p227_p3 }
  0x12   :  { %237 = shalt.err (!%p234_p7)
}
  0x13   :  { %32 = dma.hbm_to_vmem [thread:$0]  %s430_s1, 128, %s30_s16, [#allocation6]  }
  0x14   :  { %s238_s5 = scalar_lea.hbm %s429_s0, 128 }
  0x15   :  { %p239_p8 = scmp.ne.s32.totalorder %s429_s0, %s238_s5  ;;  %p242_p9 = scmp.lt.u32.totalorder %s238_s5, %s429_s0 }
  0x17   :  { %p244_p10 = pnand %p242_p9, %p239_p8 }
  0x19   :  { %247 = shalt.err (!%p244_p10)
}
  0x1a   :  { %s248_s10 = scalar_lea.vmem %s20_s18, 128  ;;  %p253_p12 = scmp.lt.s32.totalorder %s20_s18, %s20_s18 }
  0x1b   :  { %p249_p11 = scmp.ne.s32.totalorder %s20_s18, %s248_s10  ;;  %p254_p13 = scmp.lt.s32.totalorder %s248_s10, %s248_s10 }
  0x1d   :  { %p255_p0 = por %p254_p13, %p253_p12 }
  0x1f   :  { %p256_p1 = pnand %p255_p0, %p249_p11 }
  0x21   :  { %259 = shalt.err (!%p256_p1)
}
  0x22   :  { %22 = dma.hbm_to_vmem [thread:$0]  %s429_s0, 128, %s20_s18, [#allocation3]  }
  0x23   :  { %s336_s12 = smov [#allocation7]   ;;  %s260_s16 = scalar_lea.hbm %s431_s2, 512 }
  0x24   :  { %s38_s13 = sshll.u32 %s336_s12, 4  ;;  %p261_p2 = scmp.ne.s32.totalorder %s431_s2, %s260_s16  ;;  %s39_s13 = int_to_ptr.vmem [resolvable:$true] %s38_s13 }
  0x25   :  { %p264_p3 = scmp.lt.u32.totalorder %s260_s16, %s431_s2 }
  0x27   :  { %p266_p4 = pnand %p264_p3, %p261_p2 }
  0x29   :  { %269 = shalt.err (!%p266_p4)
}
  0x2a   :  { %s270_s22 = scalar_lea.vmem %s39_s13, 512  ;;  %p275_p6 = scmp.lt.s32.totalorder %s39_s13, %s39_s13 }
  0x2b   :  { %p271_p5 = scmp.ne.s32.totalorder %s39_s13, %s270_s22  ;;  %p276_p7 = scmp.lt.s32.totalorder %s270_s22, %s270_s22 }
  0x2d   :  { %p277_p8 = por %p276_p7, %p275_p6 }
  0x2f   :  { %p278_p9 = pnand %p277_p8, %p271_p5 }
  0x31   :  { %281 = shalt.err (!%p278_p9)
}
  0x32   :  { %s337_s0 = smov 128   ;;  %s338_s18 = smov 8  }
  0x33   :  { %44 = dma.hbm_to_vmem [thread:$0]  %s431_s2, 512, %s39_s13, [#allocation6], %s337_s0, %s337_s0, %s338_s18  }
  0x34   :  { %s339_s25 = smov [#allocation8]   ;;  %s282_s29 = scalar_lea.hbm %s432_s3, 16 }
  0x35   :  { %s51_s26 = sshll.u32 %s339_s25, 4  ;;  %p283_p10 = scmp.ne.s32.totalorder %s432_s3, %s282_s29  ;;  %s52_s26 = int_to_ptr.vmem [resolvable:$true] %s51_s26 }
  0x36   :  { %p286_p11 = scmp.lt.u32.totalorder %s282_s29, %s432_s3 }
  0x38   :  { %p288_p12 = pnand %p286_p11, %p283_p10 }
  0x3a   :  { %291 = shalt.err (!%p288_p12)
}
  0x3b   :  { %s292_s8 = scalar_lea.vmem %s52_s26, 16  ;;  %s296_s2 = scalar_lea.vmem %s52_s26, 32 }
  0x3c   :  { %p293_p13 = scmp.ne.s32.totalorder %s52_s26, %s292_s8  ;;  %p297_p0 = scmp.lt.s32.totalorder %s52_s26, %s52_s26 }
  0x3d   :  { %p298_p1 = scmp.lt.s32.totalorder %s296_s2, %s292_s8 }
  0x3f   :  { %p299_p2 = por %p298_p1, %p297_p0 }
  0x41   :  { %p300_p3 = pnand %p299_p2, %p293_p13 }
  0x43   :  { %303 = shalt.err (!%p300_p3)
}
  0x44   :  { %54 = dma.hbm_to_vmem [thread:$0]  %s432_s3, 16, %s52_s26, [#allocation9]  }
  0x45   :  { %326 = dma.done.wait [#allocation3], 128  }
  0x46   :  { %327 = vsyncadd [#allocation3], 4294967168 }
  0x47   :  { %328 = dma.done.wait [#allocation6], 640  }
  0x48   :  { %329 = vsyncadd [#allocation6], 4294966656 }
  0x49   :  { %330 = dma.done.wait [#allocation9], 16  }
  0x4a   :  { %331 = vsyncadd [#allocation9], 4294967280  ;;  %v340_v0 = vmov 0.0|0.0   ;;  %vm341_vm0 = vmmov 0   ;;  %v342_v1 = vmov 0.0   ;;  %v68_v2 = vld [vmem:[#allocation7] sm:$0xff] }
  0x4b   :  { %196 = vmatprep.subr.bf16.mxu0 %v340_v0  ;;  %193 = vmatprep.mubr.msk.f32.mxu0 %vm341_vm0, %v342_v1  ;;  %v69_v3 = vld [vmem:[#allocation7 + $0x8] sm:$0xff]  ;;  %v70_v4 = vld [vmem:[#allocation7 + $0x10] sm:$0xff]  ;;  %v71_v6 = vld [vmem:[#allocation7 + $0x18] sm:$0xff]  ;;  %vm79_vm1 = vcmask 261120   ;;  %s343_s3 = smov [#allocation10]  }
  0x4c   :  { %v197_v5 = vpack.c.bf16 %v69_v3, %v68_v2  ;;  %v200_v7 = vpack.c.bf16 %v71_v6, %v70_v4  ;;  %v67_v8 = vld [vmem:[#allocation2] sm:$0xff]  ;;  %v177_v9 = vld [vmem:[#allocation8] ss:$0 sm:$0xff]  ;;  %s166_s1 = sshll.u32 %s343_s3, 4  ;;  %s167_s1 = int_to_ptr.vmem [resolvable:$true] %s166_s1 }
  0x4d   :  { %s304_s11 = scalar_lea.vmem %s167_s1, 128  ;;  %p309_p5 = scmp.lt.s32.totalorder %s167_s1, %s167_s1 }
  0x4e   :  { %198 = vmatpush3.bf16.msra.mxu0 %v197_v5  ;;  %p305_p4 = scmp.ne.s32.totalorder %s167_s1, %s304_s11  ;;  %p310_p6 = scmp.lt.s32.totalorder %s304_s11, %s304_s11 }
  0x4f   :  { %199 = vmatprep.subr.bf16.mxu0 %v340_v0 }
  0x50   :  { %p311_p7 = por %p310_p6, %p309_p5 }
  0x52   :  { %201 = vmatpush3.bf16.msra.mxu0 %v200_v7  ;;  %p312_p8 = pnand %p311_p7, %p305_p4 }
  0x55   :  { %194 = vmatmul.mubr.msk.f32.vlgmr.msra.gmra.mrb[0].mxu0 %vm79_vm1, %v67_v8 }
 0x128   :  { %v149_v10 = vpop.f32.mrb[0].mxu0 }
 0x129   :  { %v150_v11 = vadd.f32 %v177_v9, %v149_v10  ;;  %v195_v12 = vpop.f32.mrb[1].mxu0 }
 0x12b   :  { %v179_v13 = vmul.f32 -1.442695, %v150_v11 }
 0x12d   :  { %212 = vpow2.f32 %v179_v13 }
 0x137   :  { %v213_v14 = vpop.eup %212 }
 0x138   :  { %v156_v15 = vadd.f32 1.0, %v213_v14 }
 0x13a   :  { %214 = vrcp.f32 %v156_v15 }
 0x144   :  { %v215_v16 = vpop.eup %214 }
 0x145   :  { %159 = vst [vmem:[#allocation10] sm:$0xff] %v215_v16 }
 0x146   :  { %315 = shalt.err (!%p312_p8)
}
 0x147   :  { %s316_s14 = scalar_lea.hbm %s433_s4, 128 }
 0x148   :  { %p317_p9 = scmp.ne.s32.totalorder %s433_s4, %s316_s14  ;;  %p320_p10 = scmp.lt.u32.totalorder %s316_s14, %s433_s4 }
 0x14a   :  { %p322_p11 = pnand %p320_p10, %p317_p9 }
 0x14c   :  { %325 = shalt.err (!%p322_p11)
}
 0x14d   :  { %169 = dma.vmem_to_hbm [thread:$0]  %s167_s1, 128, %s433_s4, [#allocation4]  }
 0x14e   :  { %332 = dma.done.wait [#allocation4], 128  }
 0x14f   :  { %333 = vsyncadd [#allocation4], 4294967168 }
 0x150   :  { %173 = vsyncpa [#allocation3], 1 }
 0x151   :  { %174 = vsyncpa [#allocation6], 1 }
 0x152   :  { %175 = vsyncpa [#allocation9], 1 }
 0x153   :  { %176 = vsyncpa [#allocation4], 1 }

</bundles_post_ra>
